<compile_context>
chip_gen: v6e
topology: v6e:2x2x1
jax: 0.10.0
libtpu: 0.0.40
codegen_flags: <defaults>
</compile_context>

<pallas_src>
import functools

import jax
import jax.numpy as jnp
from jax.experimental import pallas as pl
from jax.experimental.pallas import tpu as pltpu

# Candidate lane widths (all multiples of 128). Prefer the widest that divides
# the element count so no padding copy is required.
_WIDTHS = (8192, 4096, 2048, 1024, 512, 256, 128)
_FALLBACK_WIDTH = 1024


@functools.lru_cache(maxsize=1)
def _tuning():
    """(block_bytes_per_buffer, vmem_limit_bytes or None) for the local TPU gen."""
    try:
        kind = jax.devices()[0].device_kind.lower()
    except Exception:  # pragma: no cover - defensive; fall back to safe defaults
        kind = ""
    if "v7" in kind or "7x" in kind:
        # 2 x (in + out) x 8 MiB = 32 MiB > default scoped 32 MiB -> raise limit,
        # but stay well under the 64 MiB physical VMEM (Mosaic scratch headroom).
        return 8 * 1024 * 1024, 48 * 1024 * 1024
    if "v6" in kind:
        # 16 MiB total double-buffered fits the 32 MiB default scoped VMEM.
        return 4 * 1024 * 1024, None
    # v5e / unknown: 8 MiB total fits the 16 MiB default scoped VMEM.
    return 2 * 1024 * 1024, None


def _fix_neuron_kernel(params_ref, x_ref, o_ref, *, qmin, qmax):
    """Elementwise fake-quantize (Vitis-AI fix_neuron, method=2).

    params_ref: SMEM f32[2] = [scale_inv, zero_point]
    x_ref/o_ref: VMEM (block_rows, width) tiles.
    qmin/qmax: compile-time Python floats (quant_max is static).
    """
    scale_inv = params_ref[0]
    zero_point = params_ref[1]

    x = x_ref[...].astype(jnp.float32)
    # Unfused, sequential form for bit-parity with the reference op:
    #   t = x*scale_inv + zp; q = floor(t + 0.5); clip; (q - zp) / scale_inv
    t = x * scale_inv + zero_point
    q = jnp.floor(t + 0.5)          # method == 2: DPU round (round half up)
    q = jnp.clip(q, qmin, qmax)
    o_ref[...] = ((q - zero_point) / scale_inv).astype(o_ref.dtype)


def _choose_width(n):
    """Pick a lane width; avoid a pad copy whenever n divides a wide slab."""
    for w in _WIDTHS:
        if n % w == 0:
            return w, 0
    return _FALLBACK_WIDTH, (-n) % _FALLBACK_WIDTH


def _choose_block_rows(rows, target_rows, sublane_mult):
    """block_rows <= target_rows, multiple of the dtype sublane packing (or the
    full row extent), preferring an exact divisor of rows, and small enough
    that the grid has >= 2 steps whenever there is more than one tile of rows
    (so v7x's two TensorCores both get work)."""
    if rows <= sublane_mult:
        return rows
    # Cap at ceil(rows/2) (rounded up to the sublane multiple) -> grid >= 2.
    half = -(-rows // 2)
    half = -(-half // sublane_mult) * sublane_mult
    upper = max(sublane_mult, min(target_rows, half, rows))
    upper -= upper % sublane_mult
    # Prefer an exact divisor of rows: no masked trailing block, balanced split.
    cand = upper
    while cand >= sublane_mult:
        if rows % cand == 0:
            return cand
        cand -= sublane_mult
    return upper


@functools.partial(jax.jit, static_argnames=("quant_max", "method"))
def _fix_neuron_forward(x, scale_inv, zero_point, quant_max, method=2):
    if method != 2:
        # TODO(synk): method=-1 (torch affine round-half-to-even) and method=3
        # (std round) are not implemented; default Vitis-AI path uses method=2.
        raise NotImplementedError("only method=2 (DPU round) is implemented")

    qmin = float(-quant_max)
    qmax = float(quant_max - 1)

    orig_shape = x.shape
    orig_dtype = x.dtype
    n = x.size
    if n == 0:
        return x

    flat = x.reshape(-1)
    width, pad = _choose_width(n)
    if pad:
        # TODO(synk): rare ragged sizes still take a pad + slice round trip;
        # a single-pass masked 1-D tail path would remove the extra HBM copies.
        flat = jnp.pad(flat, (0, pad))
    rows = flat.shape[0] // width
    x2d = flat.reshape(rows, width)

    itemsize = jnp.dtype(orig_dtype).itemsize
    sublane_mult = max(8, 32 // max(1, itemsize))  # f32->8, bf16->16, i8->32
    block_bytes, vmem_limit = _tuning()
    target_rows = max(
        sublane_mult,
        (block_bytes // (width * itemsize)) // sublane_mult * sublane_mult,
    )
    block_rows = _choose_block_rows(rows, target_rows, sublane_mult)
    grid = (pl.cdiv(rows, block_rows),)  # partial trailing block (if any) is masked

    params = jnp.stack(
        [jnp.asarray(scale_inv, jnp.float32), jnp.asarray(zero_point, jnp.float32)]
    )

    kernel = functools.partial(_fix_neuron_kernel, qmin=qmin, qmax=qmax)

    cp_kwargs = dict(dimension_semantics=("parallel",))  # shards across TCs on v7x
    if vmem_limit is not None:
        cp_kwargs["vmem_limit_bytes"] = vmem_limit

    total_bytes = 2 * rows * width * itemsize  # stream in + stream out

    out2d = pl.pallas_call(
        kernel,
        out_shape=jax.ShapeDtypeStruct((rows, width), orig_dtype),
        grid=grid,
        in_specs=[
            pl.BlockSpec(memory_space=pltpu.MemorySpace.SMEM),  # params, untiled
            pl.BlockSpec((block_rows, width), lambda i: (i, 0)),
        ],
        out_specs=pl.BlockSpec((block_rows, width), lambda i: (i, 0)),
        compiler_params=pltpu.CompilerParams(**cp_kwargs),
        cost_estimate=pl.CostEstimate(
            flops=8 * rows * width, transcendentals=0, bytes_accessed=total_bytes
        ),
        # NOTE: pure HBM-streaming kernel; if the caller can donate x, adding
        # input_output_aliases={1: 0} halves peak HBM footprint (no speed change).
    )(params, x2d)

    out_flat = out2d.reshape(-1)
    if pad:
        out_flat = out_flat[:n]
    return out_flat.reshape(orig_shape)


@functools.partial(jax.custom_vjp, nondiff_argnums=(3, 4))
def fix_neuron_with_backward(x, scale_inv, zero_point, quant_max, method=2):
    """JAX/Pallas equivalent of FixNeuronWithBackward (forward + STE backward)."""
    return _fix_neuron_forward(x, scale_inv, zero_point, quant_max, method)


def _fn_fwd(x, scale_inv, zero_point, quant_max, method):
    out = _fix_neuron_forward(x, scale_inv, zero_point, quant_max, method)
    # Save the scale/zero-point primals so the backward can emit correctly
    # shaped/typed zero cotangents (FixNeuronFunc returns None grads for them).
    return out, (scale_inv, zero_point)


def _fn_bwd(quant_max, method, residuals, g):
    scale_inv, zero_point = residuals
    # FixNeuronFunc.backward: grad_input = grad_output; no grads for scale/zp.
    return (
        g,
        jnp.zeros_like(jnp.asarray(scale_inv)),
        jnp.zeros_like(jnp.asarray(zero_point)),
    )


fix_neuron_with_backward.defvjp(_fn_fwd, _fn_bwd)


def _reference(x, scale_inv, zero_point, quant_max):
    qmin = float(-quant_max)
    qmax = float(quant_max - 1)
    t = x.astype(jnp.float32) * scale_inv + zero_point
    q = jnp.clip(jnp.floor(t + 0.5), qmin, qmax)
    return ((q - zero_point) / scale_inv).astype(x.dtype)


if __name__ == "__main__":
    key = jax.random.PRNGKey(0)
    k0, k1 = jax.random.split(key)

    scale_inv = jnp.float32(16.0)   # quant scale = 1/16 (4 fractional bits)
    zero_point = jnp.float32(0.0)   # symmetric quantization
    quant_max = 128                 # int8 -> range [-128, 127]

    # Small NCHW conv activation.
    x = jax.random.normal(k0, (2, 4, 16, 16), dtype=jnp.float32) * 3.0
    out = jax.block_until_ready(
        fix_neuron_with_backward(x, scale_inv, zero_point, quant_max, 2)
    )
    ref = _reference(x, scale_inv, zero_point, quant_max)
    assert out.shape == x.shape and out.dtype == x.dtype
    assert float(jnp.max(jnp.abs(out - ref))) < 1e-5, "mismatch vs reference"

    # Ragged element count (exercises the fallback/pad path).
    x2 = jax.random.normal(k1, (3, 5, 7, 11), dtype=jnp.float32) * 5.0
    out2 = jax.block_until_ready(
        fix_neuron_with_backward(x2, scale_inv, zero_point, quant_max, 2)
    )
    ref2 = _reference(x2, scale_inv, zero_point, quant_max)
    assert float(jnp.max(jnp.abs(out2 - ref2))) < 1e-5, "ragged mismatch"

    # Straight-through backward, matching FixNeuronFunc.backward.
    y, vjp_fn = jax.vjp(
        lambda t, s, z: fix_neuron_with_backward(t, s, z, quant_max, 2),
        x, scale_inv, zero_point,
    )
    gx, gs, gz = vjp_fn(jnp.ones_like(y))
    gx = jax.block_until_ready(gx)
    assert bool(jnp.all(gx == 1.0)), "STE backward mismatch"
    assert gs.shape == scale_inv.shape and gz.shape == zero_point.shape

    print("KERNEL_OK")
</pallas_src>

<mosaic_0001>
module attributes {stable_mosaic.version = 11 : i64} {
  func.func @_fix_neuron_kernel(%arg0: i32, %arg1: memref<2xf32, #tpu.memory_space<smem>>, %arg2: memref<1x2048xf32, #tpu.memory_space<vmem>>, %arg3: memref<1x2048xf32, #tpu.memory_space<vmem>>) attributes {dimension_semantics = [#tpu.dimension_semantics<parallel>], iteration_bounds = array<i64: 1>, scalar_prefetch = 0 : i64, scratch_operands = 0 : i64, tpu.core_type = #tpu.core_type<tc>, window_params = [{transform_indices = @transform_0, window_bounds = array<i64: 2>}, {transform_indices = @transform_1, window_bounds = array<i64: 1, 2048>}, {transform_indices = @transform_2, window_bounds = array<i64: 1, 2048>}]} {
    %c0 = arith.constant 0 : index
    %0 = memref.load %arg1[%c0] : memref<2xf32, #tpu.memory_space<smem>>
    %c1 = arith.constant 1 : index
    %1 = memref.load %arg1[%c1] : memref<2xf32, #tpu.memory_space<smem>>
    %c0_0 = arith.constant 0 : index
    %c0_1 = arith.constant 0 : index
    %2 = vector.load %arg2[%c0_0, %c0_1] : memref<1x2048xf32, #tpu.memory_space<vmem>>, vector<1x2048xf32>
    %3 = vector.broadcast %0 : f32 to vector<1x2048xf32>
    %4 = arith.mulf %2, %3 : vector<1x2048xf32>
    %5 = vector.broadcast %1 : f32 to vector<1x2048xf32>
    %6 = arith.addf %4, %5 : vector<1x2048xf32>
    %cst = arith.constant 5.000000e-01 : f32
    %7 = vector.broadcast %cst : f32 to vector<1x2048xf32>
    %8 = arith.addf %6, %7 : vector<1x2048xf32>
    %9 = math.floor %8 : vector<1x2048xf32>
    %cst_2 = arith.constant -1.280000e+02 : f32
    %cst_3 = arith.constant 1.270000e+02 : f32
    %10 = vector.broadcast %cst_2 : f32 to vector<1x2048xf32>
    %11 = arith.maximumf %10, %9 : vector<1x2048xf32>
    %12 = vector.broadcast %cst_3 : f32 to vector<1x2048xf32>
    %13 = arith.minimumf %12, %11 : vector<1x2048xf32>
    %14 = vector.broadcast %1 : f32 to vector<1x2048xf32>
    %15 = arith.subf %13, %14 : vector<1x2048xf32>
    %16 = vector.broadcast %0 : f32 to vector<1x2048xf32>
    %17 = arith.divf %15, %16 : vector<1x2048xf32>
    %c0_4 = arith.constant 0 : index
    %c0_5 = arith.constant 0 : index
    %18 = vector.load %arg3[%c0_4, %c0_5] : memref<1x2048xf32, #tpu.memory_space<vmem>>, vector<1x2048xf32>
    tpu.vector_store %arg3[%c0_4, %c0_5], %17 {strides = array<i32>} : memref<1x2048xf32, #tpu.memory_space<vmem>>, vector<1x2048xf32>,
    return
  }
  func.func @transform_0(%arg0: i32) -> i32 {
    %c0_i32 = arith.constant 0 : i32
    %c0_i32_0 = arith.constant 0 : i32
    return %c0_i32 : i32
  }
  func.func @transform_1(%arg0: i32) -> (i32, i32) {
    %c0_i32 = arith.constant 0 : i32
    %c0_i32_0 = arith.constant 0 : i32
    return %arg0, %c0_i32 : i32, i32
  }
  func.func @transform_2(%arg0: i32) -> (i32, i32) {
    %c0_i32 = arith.constant 0 : i32
    %c0_i32_0 = arith.constant 0 : i32
    return %arg0, %c0_i32 : i32, i32
  }
}

</mosaic_0001>

<bundles_post_ra>
// kernel: _fix_neuron_forward.1
= control target key start
LH: loop header
LB: loop body
LE: loop exit
PB: predicated region body
PF: predicated region fallthrough
CT: control target
= control target key end

     0   :  { %7 = vsyncpa [#allocation3], 0  ;;  %s103_s0 = inlined_call_operand.vmem [shape: f32[2], index: 0, kind: input, shape index: {}]   ;;  %s104_s1 = inlined_call_operand.vmem [shape: f32[1,2048], index: 1, kind: input, shape index: {}]   ;;  %s105_s2 = inlined_call_operand.vmem [shape: f32[1,2048], index: 2, kind: output, shape index: {}]  }
   0x1   :  { %s14_s11 = sshll.u32 %s103_s0, 4  ;;  %s15_s11 = int_to_ptr.vmem [resolvable:$true] %s14_s11 }
   0x2   :  { %s58_s12 = scalar_lea.vmem %s15_s11, 16  ;;  %p63_p1 = scmp.lt.s32.totalorder %s15_s11, %s15_s11 }
   0x3   :  { %p59_p0 = scmp.ne.s32.totalorder %s15_s11, %s58_s12  ;;  %p64_p2 = scmp.lt.s32.totalorder %s58_s12, %s58_s12 }
   0x5   :  { %p65_p3 = por %p64_p2, %p63_p1 }
   0x7   :  { %p66_p4 = pnand %p65_p3, %p59_p0 }
   0x9   :  { %69 = shalt.err (!%p66_p4)
}
   0xa   :  { %s72_s13 = smov [#allocation2]  }
   0xb   :  { %17 = dma.vmem_to_smem %s15_s11, 16, %s72_s13, [#allocation3]  }
   0xc   :  { %70 = dma.done.wait [#allocation3], 16  }
   0xd   :  { %71 = vsyncadd [#allocation3], 4294967280 }
   0xe   :  { %23 = sfence }
   0xf   :  { %s24_s14 = sld [smem:[#allocation2]]  ;;  %v26_v0 = vld [vmem:[%s104_s1] sm:$0xff]  ;;  %v27_v1 = vld [vmem:[%s104_s1 + $0x8] sm:$0xff] }
  0x10   :  { %s54_s15 = sld [smem:[#allocation2 + $0x1]] }
  0x15   :  { %v28_v2 = vstv %s24_s14 }
  0x16   :  { %v29_v3 = vmul.f32 %v28_v2, %v26_v0  ;;  %v31_v4 = vstv %s54_s15  ;;  %56 = vrcp.f32 %v28_v2  ;;  %v30_v5 = vmul.f32 %v28_v2, %v27_v1 }
  0x18   :  { %v32_v6 = vadd.f32 %v31_v4, %v29_v3  ;;  %v33_v7 = vadd.f32 %v31_v4, %v30_v5 }
  0x1a   :  { %v34_v8 = vadd.f32 0.5, %v32_v6  ;;  %v35_v9 = vadd.f32 0.5, %v33_v7 }
  0x1c   :  { %v36_v10 = vfloor.f32 %v34_v8  ;;  %v37_v11 = vfloor.f32 %v35_v9 }
  0x1e   :  { %v38_v12 = vmax.f32 %v36_v10, -128.0  ;;  %v39_v13 = vmax.f32 %v37_v11, -128.0 }
  0x20   :  { %v40_v14 = vmin.f32 %v38_v12, 127.0  ;;  %v41_v15 = vmin.f32 %v39_v13, 127.0 }
  0x22   :  { %v42_v16 = vsub.f32 %v40_v14, %v31_v4  ;;  %v43_v17 = vsub.f32 %v41_v15, %v31_v4 }
  0x23   :  { %v57_v18 = vpop.eup %56 }
  0x24   :  { %v45_v19 = vmul.f32 %v57_v18, %v42_v16  ;;  %v46_v20 = vmul.f32 %v57_v18, %v43_v17 }
  0x26   :  { %47 = vst [vmem:[%s105_s2] sm:$0xff] %v45_v19  ;;  %48 = vst [vmem:[%s105_s2 + $0x8] sm:$0xff] %v46_v20 }
  0x27   :  { %53 = vsyncpa [#allocation3], 1 }

</bundles_post_ra>
